<compile_context>
chip_gen: v7x
topology: tpu7x:2x2x1
jax: 0.10.0
libtpu: 0.0.40
codegen_flags: <defaults>
</compile_context>

<pallas_src>
import jax
import jax.numpy as jnp
from jax import lax
from jax.experimental import pallas as pl
from jax.experimental.pallas import tpu as pltpu

INPUT_DIM = 64
HIDDEN_DIM = 128


# ---------------- pass 1: parallel input projection ----------------

def proj_kernel(x_ref, wih_ref, b_ref, o_ref):
    # o = x @ W_ih^T + (b_ih + b_hh); bf16 operands, f32 accumulation, f32 output.
    o_ref[...] = (
        jnp.dot(x_ref[...], wih_ref[...], preferred_element_type=jnp.float32)
        + b_ref[...]
    )


# ---------------- pass 2: sequential recurrence ---------------------

def make_recurrence_kernel(seq_len, t_blk, mxu_dtype, needs_mask):
    def kernel(ih_ref, whh_ref, h_out_ref, h_scratch):
        chunk = pl.program_id(1)          # time-chunk axis ('arbitrary', carries h)

        @pl.when(chunk == 0)
        def _():
            # PyTorch forward starts from hidden = zeros(128).
            h_scratch[...] = jnp.zeros_like(h_scratch)

        whh = whh_ref[...]                # (128, 128), resident for the whole chunk
        base = chunk * t_blk

        def step(t, h):
            hh = jnp.dot(h.astype(mxu_dtype), whh,
                         preferred_element_type=jnp.float32)
            h_new = jnp.tanh(ih_ref[t] + hh)
            if needs_mask:                # padded timesteps of a partial last chunk
                h_new = jnp.where(base + t < seq_len, h_new, h)
            return h_new

        # Only h carries a true dependence; unrolling lets the LLO scheduler overlap
        # the next step's ih load / tanh (EUP) with the current W_hh matmul drain.
        unroll = True if t_blk <= 16 else 8
        h_scratch[...] = lax.fori_loop(0, t_blk, step, h_scratch[...], unroll=unroll)

        @pl.when(chunk == pl.num_programs(1) - 1)
        def _():
            h_out_ref[...] = h_scratch[...]

    return kernel


def rnn_forward(x, w_ih, b_ih, w_hh, b_hh, *, mxu_dtype=jnp.bfloat16):
    """x: (S, B, 64). Weights in PyTorch convention:
    w_ih: (128, 64), b_ih: (128,), w_hh: (128, 128), b_hh: (128,).
    Returns final hidden state (B, 128) in float32."""
    S, B, D = x.shape
    assert D == INPUT_DIM

    # ---- batch packing: fill vreg sublanes / MXU rows ----
    if B <= 128:
        b_pad = max(8, ((B + 7) // 8) * 8)
        b_tile = b_pad
    else:
        b_pad = ((B + 127) // 128) * 128
        b_tile = 128

    x = x.astype(jnp.float32)
    if b_pad != B:
        x = jnp.pad(x, ((0, 0), (0, b_pad - B), (0, 0)))

    # Weights pre-transposed to (in, out); biases folded into a single (1, 128) add.
    wih_t = w_ih.T.astype(mxu_dtype)                       # (64, 128)
    whh_t = w_hh.T.astype(mxu_dtype)                       # (128, 128)
    bias = (b_ih + b_hh).reshape(1, HIDDEN_DIM).astype(jnp.float32)

    # ---- pass 1: ih_all = x @ W_ih^T + bias, parallel over S*B_pad rows ----
    rows = S * b_pad
    x_flat = x.reshape(rows, INPUT_DIM).astype(mxu_dtype)
    row_blk = min(rows, 512)                               # rows is a multiple of 8
    ih_flat = pl.pallas_call(
        proj_kernel,
        out_shape=jax.ShapeDtypeStruct((rows, HIDDEN_DIM), jnp.float32),
        grid_spec=pltpu.PrefetchScalarGridSpec(
            num_scalar_prefetch=0,
            grid=(pl.cdiv(rows, row_blk),),
            in_specs=[
                pl.BlockSpec((row_blk, INPUT_DIM), lambda r: (r, 0)),       # x rows
                pl.BlockSpec((INPUT_DIM, HIDDEN_DIM), lambda r: (0, 0)),    # W_ih^T
                pl.BlockSpec((1, HIDDEN_DIM), lambda r: (0, 0)),            # fused bias
            ],
            out_specs=pl.BlockSpec((row_blk, HIDDEN_DIM), lambda r: (r, 0)),
        ),
        compiler_params=pltpu.CompilerParams(
            dimension_semantics=("parallel",),
        ),
    )(x_flat, wih_t, bias)
    ih_all = ih_flat.reshape(S, b_pad, HIDDEN_DIM)

    # ---- pass 2: recurrence; 'parallel' batch tiles x 'arbitrary' time chunks ----
    # T_BLK=64, b_tile<=128 f32 => <= 4 MiB per ih block (double-buffered 8 MiB):
    # comfortably inside the scoped-VMEM default even on v7x (64 MiB physical).
    t_blk = S if S <= 64 else 64
    needs_mask = (S % t_blk) != 0
    n_chunks = pl.cdiv(S, t_blk)

    h_final = pl.pallas_call(
        make_recurrence_kernel(S, t_blk, mxu_dtype, needs_mask),
        out_shape=jax.ShapeDtypeStruct((b_pad, HIDDEN_DIM), jnp.float32),
        grid_spec=pltpu.PrefetchScalarGridSpec(
            num_scalar_prefetch=0,
            grid=(b_pad // b_tile, n_chunks),
            in_specs=[
                pl.BlockSpec((t_blk, b_tile, HIDDEN_DIM), lambda b, c: (c, b, 0)),
                pl.BlockSpec((HIDDEN_DIM, HIDDEN_DIM), lambda b, c: (0, 0)),
            ],
            out_specs=pl.BlockSpec((b_tile, HIDDEN_DIM), lambda b, c: (b, 0)),
            scratch_shapes=[pltpu.VMEM((b_tile, HIDDEN_DIM), jnp.float32)],
        ),
        compiler_params=pltpu.CompilerParams(
            dimension_semantics=("parallel", "arbitrary"),
        ),
    )(ih_all, whh_t)

    return h_final[:B]


def rnn_reference(x, w_ih, b_ih, w_hh, b_hh):
    """Pure-JAX f32 reference mirroring the PyTorch forward (exact-f32 matmuls)."""
    S = x.shape[0]
    hp = jax.lax.Precision.HIGHEST
    h = jnp.zeros((HIDDEN_DIM,), jnp.float32)
    for i in range(S):
        h = jnp.tanh(jnp.dot(x[i], w_ih.T, precision=hp) + b_ih
                     + jnp.dot(h, w_hh.T, precision=hp) + b_hh)
    return h


if __name__ == "__main__":
    key = jax.random.PRNGKey(0)
    k_x, k_wih, k_bih, k_whh, k_bhh = jax.random.split(key, 5)

    seq_len, batch = 8, 2
    x = jax.random.normal(k_x, (seq_len, batch, INPUT_DIM), jnp.float32)

    # Deterministic parameter init (uniform, like torch.nn.Linear's default range).
    bound_ih = 1.0 / (INPUT_DIM ** 0.5)
    bound_hh = 1.0 / (HIDDEN_DIM ** 0.5)
    w_ih = jax.random.uniform(k_wih, (HIDDEN_DIM, INPUT_DIM), jnp.float32,
                              -bound_ih, bound_ih)
    b_ih = jax.random.uniform(k_bih, (HIDDEN_DIM,), jnp.float32,
                              -bound_ih, bound_ih)
    w_hh = jax.random.uniform(k_whh, (HIDDEN_DIM, HIDDEN_DIM), jnp.float32,
                              -bound_hh, bound_hh)
    b_hh = jax.random.uniform(k_bhh, (HIDDEN_DIM,), jnp.float32,
                              -bound_hh, bound_hh)

    out = rnn_forward(x, w_ih, b_ih, w_hh, b_hh)
    out = jax.block_until_ready(out)

    ref = rnn_reference(x, w_ih, b_ih, w_hh, b_hh)
    assert out.shape == (batch, HIDDEN_DIM)
    # bf16 MXU operands (f32 accumulate, f32 recurrent state) vs exact-f32 reference.
    assert jnp.allclose(out, ref, atol=3e-2, rtol=0), "mismatch vs reference"

    print("KERNEL_OK")
</pallas_src>

<mosaic_0001>
module attributes {stable_mosaic.version = 11 : i64} {
  func.func @proj_kernel(%arg0: i32, %arg1: memref<64x64xbf16, #tpu.memory_space<vmem>>, %arg2: memref<64x128xbf16, #tpu.memory_space<vmem>>, %arg3: memref<1x128xf32, #tpu.memory_space<vmem>>, %arg4: memref<64x128xf32, #tpu.memory_space<vmem>>) attributes {dimension_semantics = [#tpu.dimension_semantics<parallel>], iteration_bounds = array<i64: 1>, scalar_prefetch = 0 : i64, scratch_operands = 0 : i64, tpu.core_type = #tpu.core_type<tc>, window_params = [{transform_indices = @transform_0, window_bounds = array<i64: 64, 64>}, {pipeline_mode = #tpu.pipeline_mode<synchronous>, transform_indices = @transform_1, window_bounds = array<i64: 64, 128>}, {pipeline_mode = #tpu.pipeline_mode<synchronous>, transform_indices = @transform_2, window_bounds = array<i64: 1, 128>}, {transform_indices = @transform_3, window_bounds = array<i64: 64, 128>}]} {
    %c0 = arith.constant 0 : index
    %c0_0 = arith.constant 0 : index
    %0 = vector.load %arg1[%c0, %c0_0] : memref<64x64xbf16, #tpu.memory_space<vmem>>, vector<64x64xbf16>
    %c0_1 = arith.constant 0 : index
    %c0_2 = arith.constant 0 : index
    %1 = vector.load %arg2[%c0_1, %c0_2] : memref<64x128xbf16, #tpu.memory_space<vmem>>, vector<64x128xbf16>
    %cst = arith.constant dense<0.000000e+00> : vector<64x128xf32>
    %2 = tpu.matmul %0, %1, %cst {dimension_numbers = #tpu.dot_dimension_numbers<[1], [0], [0], [1], [0, 0, 1, 1], [], []>} : vector<64x64xbf16>, vector<64x128xbf16>, vector<64x128xf32> -> vector<64x128xf32>
    %c0_3 = arith.constant 0 : index
    %c0_4 = arith.constant 0 : index
    %3 = vector.load %arg3[%c0_3, %c0_4] : memref<1x128xf32, #tpu.memory_space<vmem>>, vector<1x128xf32>
    %4 = vector.broadcast %3 : vector<1x128xf32> to vector<64x128xf32>
    %5 = arith.addf %2, %4 : vector<64x128xf32>
    %c0_5 = arith.constant 0 : index
    %c0_6 = arith.constant 0 : index
    %6 = vector.load %arg4[%c0_5, %c0_6] : memref<64x128xf32, #tpu.memory_space<vmem>>, vector<64x128xf32>
    tpu.vector_store %arg4[%c0_5, %c0_6], %5 {strides = array<i32>} : memref<64x128xf32, #tpu.memory_space<vmem>>, vector<64x128xf32>,
    return
  }
  func.func @transform_0(%arg0: i32) -> (i32, i32) {
    %c0_i32 = arith.constant 0 : i32
    %c0_i32_0 = arith.constant 0 : i32
    return %arg0, %c0_i32 : i32, i32
  }
  func.func @transform_1(%arg0: i32) -> (i32, i32) {
    %c0_i32 = arith.constant 0 : i32
    %c0_i32_0 = arith.constant 0 : i32
    %c0_i32_1 = arith.constant 0 : i32
    return %c0_i32, %c0_i32_0 : i32, i32
  }
  func.func @transform_2(%arg0: i32) -> (i32, i32) {
    %c0_i32 = arith.constant 0 : i32
    %c0_i32_0 = arith.constant 0 : i32
    %c0_i32_1 = arith.constant 0 : i32
    return %c0_i32, %c0_i32_0 : i32, i32
  }
  func.func @transform_3(%arg0: i32) -> (i32, i32) {
    %c0_i32 = arith.constant 0 : i32
    %c0_i32_0 = arith.constant 0 : i32
    return %arg0, %c0_i32 : i32, i32
  }
}

</mosaic_0001>

<bundles_post_ra>
// kernel: tpu_custom_call.1
= control target key start
LH: loop header
LB: loop body
LE: loop exit
PB: predicated region body
PF: predicated region fallthrough
CT: control target
= control target key end

     0   :  { %8 = vsyncpa [#allocation3], 0  ;;  %s417_s0 = inlined_call_operand.hbm [shape: bf16[64,64], index: 0, kind: input, shape index: {}]   ;;  %s418_s1 = inlined_call_operand.hbm [shape: bf16[64,128], index: 1, kind: input, shape index: {}]   ;;  %s419_s2 = inlined_call_operand.vmem [shape: f32[1,128], index: 2, kind: input, shape index: {}]   ;;  %s420_s3 = inlined_call_operand.hbm [shape: f32[64,128], index: 3, kind: output, shape index: {}]  }
   0x1   :  { %9 = vsyncpa [#allocation6], 0 }
   0x2   :  { %10 = vsyncpa [#allocation4], 0  ;;  %s347_s12 = smov [#allocation2]   ;;  %s275_s16 = scalar_lea.hbm %s417_s0, 512 }
   0x3   :  { %s16_s13 = sshll.u32 %s347_s12, 4  ;;  %p276_p0 = scmp.ne.s32.totalorder %s417_s0, %s275_s16  ;;  %s17_s13 = int_to_ptr.vmem [resolvable:$true] %s16_s13 }
   0x4   :  { %p279_p1 = scmp.lt.u32.totalorder %s275_s16, %s417_s0 }
   0x6   :  { %p281_p2 = pnand %p279_p1, %p276_p0 }
   0x8   :  { %284 = shalt.err (!%p281_p2)
}
   0x9   :  { %s285_s21 = scalar_lea.vmem %s17_s13, 512  ;;  %p290_p4 = scmp.lt.s32.totalorder %s17_s13, %s17_s13 }
   0xa   :  { %p286_p3 = scmp.ne.s32.totalorder %s17_s13, %s285_s21  ;;  %p291_p5 = scmp.lt.s32.totalorder %s285_s21, %s285_s21 }
   0xc   :  { %p292_p6 = por %p291_p5, %p290_p4 }
   0xe   :  { %p293_p7 = pnand %p292_p6, %p286_p3 }
  0x10   :  { %296 = shalt.err (!%p293_p7)
}
  0x11   :  { %s348_s22 = smov 64   ;;  %s349_s23 = smov 4  }
  0x12   :  { %22 = dma.hbm_to_vmem [thread:$0]  %s417_s0, 512, %s17_s13, [#allocation3], %s348_s22, %s348_s22, %s349_s23  }
  0x13   :  { %s350_s26 = smov [#allocation5]   ;;  %s297_s30 = scalar_lea.hbm %s418_s1, 512 }
  0x14   :  { %s28_s27 = sshll.u32 %s350_s26, 4  ;;  %p298_p8 = scmp.ne.s32.totalorder %s418_s1, %s297_s30  ;;  %s29_s27 = int_to_ptr.vmem [resolvable:$true] %s28_s27 }
  0x15   :  { %p301_p9 = scmp.lt.u32.totalorder %s297_s30, %s418_s1 }
  0x17   :  { %p303_p10 = pnand %p301_p9, %p298_p8 }
  0x19   :  { %306 = shalt.err (!%p303_p10)
}
  0x1a   :  { %s307_s8 = scalar_lea.vmem %s29_s27, 512  ;;  %p312_p12 = scmp.lt.s32.totalorder %s29_s27, %s29_s27 }
  0x1b   :  { %p308_p11 = scmp.ne.s32.totalorder %s29_s27, %s307_s8  ;;  %p313_p13 = scmp.lt.s32.totalorder %s307_s8, %s307_s8 }
  0x1d   :  { %p314_p0 = por %p313_p13, %p312_p12 }
  0x1f   :  { %p315_p1 = pnand %p314_p0, %p308_p11 }
  0x21   :  { %318 = shalt.err (!%p315_p1)
}
  0x22   :  { %34 = dma.hbm_to_vmem [thread:$0]  %s418_s1, 512, %s29_s27, [#allocation6], %s348_s22, %s348_s22, %s349_s23  }
  0x23   :  { %341 = dma.done.wait [#allocation3], 512  }
  0x24   :  { %342 = vsyncadd [#allocation3], 4294966784 }
  0x25   :  { %343 = dma.done.wait [#allocation6], 512  }
  0x26   :  { %344 = vsyncadd [#allocation6], 4294966784  ;;  %v267_v0 = vld [vmem:[#allocation5] sm:$0xff]   ;;  %v268_v1 = vld [vmem:[#allocation5 + $0x8] sm:$0xff]   ;;  %vm111_vm0 = vcmask 523264   ;;  %s351_s11 = smov [#allocation7]  }
  0x27   :  { %236 = vmatprep.subr.bf16.mxu0 %v267_v0  ;;  %252 = vmatprep.subr.bf16.mxu1 %v267_v0  ;;  %v269_v2 = vld [vmem:[#allocation5 + $0x10] sm:$0xff]   ;;  %v271_v3 = vld [vmem:[#allocation2] sm:$0xff]   ;;  %v270_v5 = vld [vmem:[#allocation5 + $0x18] sm:$0xff]   ;;  %s202_s12 = sshll.u32 %s351_s11, 4  ;;  %s203_s12 = int_to_ptr.vmem [resolvable:$true] %s202_s12 }
  0x28   :  { %237 = vmatpush3.bf16.msra.mxu0 %v267_v0  ;;  %256 = vmatpush3.bf16.msra.mxu1 %v267_v0  ;;  %v272_v4 = vld [vmem:[#allocation2 + $0x10] sm:$0xff]   ;;  %v273_v6 = vld [vmem:[#allocation2 + $0x8] sm:$0xff]   ;;  %v274_v7 = vld [vmem:[#allocation2 + $0x18] sm:$0xff]   ;;  %p324_p3 = scmp.lt.s32.totalorder %s203_s12, %s203_s12 }
  0x29   :  { %238 = vmatprep.subr.bf16.mxu0 %v268_v1  ;;  %253 = vmatprep.subr.bf16.mxu1 %v268_v1  ;;  %v215_v8 = vld [vmem:[%s419_s2] ss:$0 sm:$0xff]  ;;  %s319_s2 = scalar_lea.vmem %s203_s12, 1024 }
  0x2a   :  { %244 = vmatprep.mubr.msk.bf16.mxu0 %vm111_vm0, %v271_v3  ;;  %248 = vmatprep.mubr.msk.bf16.mxu1 %vm111_vm0, %v272_v4  ;;  %p320_p2 = scmp.ne.s32.totalorder %s203_s12, %s319_s2  ;;  %p325_p4 = scmp.lt.s32.totalorder %s319_s2, %s319_s2 }
  0x2c   :  { %239 = vmatpush3.bf16.msra.mxu0 %v268_v1  ;;  %257 = vmatpush3.bf16.msra.mxu1 %v268_v1  ;;  %p326_p5 = por %p325_p4, %p324_p3 }
  0x2d   :  { %240 = vmatprep.subr.bf16.mxu0 %v269_v2  ;;  %254 = vmatprep.subr.bf16.mxu1 %v269_v2 }
  0x2e   :  { %p327_p6 = pnand %p326_p5, %p320_p2 }
  0x30   :  { %241 = vmatpush3.bf16.msra.mxu0 %v269_v2  ;;  %258 = vmatpush3.bf16.msra.mxu1 %v269_v2 }
  0x31   :  { %242 = vmatprep.subr.bf16.mxu0 %v270_v5  ;;  %255 = vmatprep.subr.bf16.mxu1 %v270_v5 }
  0x34   :  { %243 = vmatpush3.bf16.msra.mxu0 %v270_v5  ;;  %259 = vmatpush3.bf16.msra.mxu1 %v270_v5 }
  0x37   :  { %245 = vmatmul.mubr.msk.bf16.vlgmr.msra.gmra.mrb[0].mxu0 %vm111_vm0, %v273_v6  ;;  %249 = vmatmul.mubr.msk.bf16.vlgmr.msra.gmra.mrb[0].mxu1 %vm111_vm0, %v274_v7 }
 0x10a   :  { %v246_v9 = vpop.f32.mrb[0].mxu0  ;;  %v250_v10 = vpop.f32.mrb[0].mxu1 }
 0x10b   :  { %v167_v11 = vadd.f32 %v246_v9, %v215_v8  ;;  %v183_v12 = vadd.f32 %v250_v10, %v215_v8  ;;  %v158_v13 = vpop.f32.mrb[1].mxu0  ;;  %v174_v14 = vpop.f32.mrb[1].mxu1 }
 0x10c   :  { %v159_v15 = vadd.f32 %v215_v8, %v158_v13  ;;  %v175_v16 = vadd.f32 %v215_v8, %v174_v14  ;;  %v247_v17 = vpop.f32.mrb[2].mxu0  ;;  %v251_v18 = vpop.f32.mrb[2].mxu1 }
 0x10d   :  { %191 = vst [vmem:[#allocation7 + $0x10] sm:$0xff] %v167_v11  ;;  %195 = vst [vmem:[#allocation7 + $0x30] sm:$0xff] %v183_v12  ;;  %v170_v19 = vadd.f32 %v247_v17, %v215_v8  ;;  %v186_v20 = vadd.f32 %v251_v18, %v215_v8  ;;  %v161_v21 = vpop.f32.mrb[3].mxu0  ;;  %v177_v22 = vpop.f32.mrb[3].mxu1 }
 0x10e   :  { %189 = vst [vmem:[#allocation7] sm:$0xff] %v159_v15  ;;  %193 = vst [vmem:[#allocation7 + $0x20] sm:$0xff] %v175_v16  ;;  %v162_v23 = vadd.f32 %v215_v8, %v161_v21  ;;  %v178_v24 = vadd.f32 %v215_v8, %v177_v22 }
 0x10f   :  { %192 = vst [vmem:[#allocation7 + $0x18] sm:$0xff] %v170_v19  ;;  %196 = vst [vmem:[#allocation7 + $0x38] sm:$0xff] %v186_v20 }
 0x110   :  { %190 = vst [vmem:[#allocation7 + $0x8] sm:$0xff] %v162_v23  ;;  %194 = vst [vmem:[#allocation7 + $0x28] sm:$0xff] %v178_v24 }
 0x111   :  { %330 = shalt.err (!%p327_p6)
}
 0x112   :  { %s331_s15 = scalar_lea.hbm %s420_s3, 1024 }
 0x113   :  { %p332_p7 = scmp.ne.s32.totalorder %s420_s3, %s331_s15  ;;  %p335_p8 = scmp.lt.u32.totalorder %s331_s15, %s420_s3 }
 0x115   :  { %p337_p9 = pnand %p335_p8, %p332_p7 }
 0x117   :  { %340 = shalt.err (!%p337_p9)
}
 0x118   :  { %s352_s20 = smov 128   ;;  %s353_s21 = smov 8  }
 0x119   :  { %208 = dma.vmem_to_hbm [thread:$0]  %s203_s12, 1024, %s420_s3, [#allocation4], %s352_s20, %s352_s20, %s353_s21  }
 0x11a   :  { %345 = dma.done.wait [#allocation4], 1024  }
 0x11b   :  { %346 = vsyncadd [#allocation4], 4294966272 }
 0x11c   :  { %212 = vsyncpa [#allocation3], 1 }
 0x11d   :  { %213 = vsyncpa [#allocation6], 1 }
 0x11e   :  { %214 = vsyncpa [#allocation4], 1 }

</bundles_post_ra>
